<compile_context>
chip_gen: v7x
topology: tpu7x:2x2x1
jax: 0.10.0
libtpu: 0.0.40
codegen_flags: <defaults>
</compile_context>

<pallas_src>
import jax
import jax.numpy as jnp
from jax.experimental import pallas as pl
from jax.experimental.pallas import tpu as pltpu

N_ACTIONS = 100
cell = 4
regionnum = cell * cell
N_STATES = 3 * regionnum + 1  # 49
HIDDEN = 100

PAD_K = 128          # padded input-feature width (49 -> 128): lane-dense loads
PAD_N = 128          # padded hidden / output width (100 -> 128): unmasked stores
MAX_TILE_B = 256     # batch rows per grid step (multiple of 8)


def _round_up(n, m):
    return ((n + m - 1) // m) * m


def _net_kernel(x_ref, w1t_ref, b1_ref, w2t_ref, b2_ref, out_ref):
    # x:    [TILE_B, 128]  (cols 49..127 zero)
    # w1t:  [128, 128]     (rows >= 49 and cols >= 100 zero)   b1: [1, 128]
    # w2t:  [128, 128]     (rows/cols >= 100 zero)             b2: [1, 128]
    # out:  [TILE_B, 128]  (lane-dense store; cols 100..127 carry zeros)
    x = x_ref[...]
    h = jnp.dot(x, w1t_ref[...], preferred_element_type=jnp.float32) + b1_ref[...]
    h = jnp.maximum(h, 0.0)                                   # ReLU (VPU, f32)
    y = jnp.dot(h, w2t_ref[...], preferred_element_type=jnp.float32) + b2_ref[...]
    out_ref[...] = y.astype(out_ref.dtype)


def prepare_params(w1, b1, w2, b2):
    """One-time parameter prep: transpose to [in, out] and zero-pad to the
    lane-aligned (128) feature widths used inside the kernel.

    w1: [HIDDEN, N_STATES], b1: [HIDDEN], w2: [N_ACTIONS, HIDDEN], b2: [N_ACTIONS]
    """
    w1t_p = jnp.zeros((PAD_K, PAD_N), jnp.float32)
    w1t_p = w1t_p.at[:N_STATES, :HIDDEN].set(jnp.transpose(w1).astype(jnp.float32))
    b1_p = jnp.zeros((1, PAD_N), jnp.float32).at[:, :HIDDEN].set(
        b1.astype(jnp.float32).reshape(1, HIDDEN))

    w2t_p = jnp.zeros((PAD_N, PAD_N), jnp.float32)
    w2t_p = w2t_p.at[:HIDDEN, :N_ACTIONS].set(jnp.transpose(w2).astype(jnp.float32))
    b2_p = jnp.zeros((1, PAD_N), jnp.float32).at[:, :N_ACTIONS].set(
        b2.astype(jnp.float32).reshape(1, N_ACTIONS))
    return w1t_p, b1_p, w2t_p, b2_p


@jax.jit
def net_forward(x, w1t_p, b1_p, w2t_p, b2_p):
    """x: [B, N_STATES]; padded params from `prepare_params`.
    Returns [B, N_ACTIONS] (f32)."""
    B, F = x.shape
    tile_b = min(MAX_TILE_B, _round_up(B, 8))
    Bp = _round_up(B, tile_b)
    # Single fused pad: batch rows up to a tile multiple, features 49 -> 128.
    x = jnp.pad(x.astype(jnp.float32), ((0, Bp - B), (0, PAD_K - F)))

    out = pl.pallas_call(
        _net_kernel,
        out_shape=jax.ShapeDtypeStruct((Bp, PAD_N), jnp.float32),
        grid=(Bp // tile_b,),
        in_specs=[
            pl.BlockSpec((tile_b, PAD_K), lambda i: (i, 0)),   # x: streamed
            pl.BlockSpec((PAD_K, PAD_N), lambda i: (0, 0)),    # w1t: resident
            pl.BlockSpec((1, PAD_N), lambda i: (0, 0)),        # b1: resident
            pl.BlockSpec((PAD_N, PAD_N), lambda i: (0, 0)),    # w2t: resident
            pl.BlockSpec((1, PAD_N), lambda i: (0, 0)),        # b2: resident
        ],
        out_specs=pl.BlockSpec((tile_b, PAD_N), lambda i: (i, 0)),
        compiler_params=pltpu.CompilerParams(
            dimension_semantics=("parallel",)),
    )(x, w1t_p, b1_p, w2t_p, b2_p)

    return out[:B, :N_ACTIONS]


def _reference(x, w1, b1, w2, b2):
    h = jnp.maximum(x @ w1.T + b1, 0.0)
    return h @ w2.T + b2


if __name__ == "__main__":
    key = jax.random.PRNGKey(0)
    k_x, k_w1, k_b1, k_w2, k_b2, k_xl = jax.random.split(key, 6)

    # Deterministic parameter init (weights ~ N(0, 0.1) as in the PyTorch init).
    w1 = 0.1 * jax.random.normal(k_w1, (HIDDEN, N_STATES), dtype=jnp.float32)
    b1 = jax.random.uniform(k_b1, (HIDDEN,), dtype=jnp.float32,
                            minval=-1.0 / jnp.sqrt(N_STATES),
                            maxval=1.0 / jnp.sqrt(N_STATES))
    w2 = 0.1 * jax.random.normal(k_w2, (N_ACTIONS, HIDDEN), dtype=jnp.float32)
    b2 = jax.random.uniform(k_b2, (N_ACTIONS,), dtype=jnp.float32,
                            minval=-1.0 / jnp.sqrt(HIDDEN),
                            maxval=1.0 / jnp.sqrt(HIDDEN))

    # One-time weight prep (hoisted out of the per-call path).
    params = prepare_params(w1, b1, w2, b2)

    # Small inference-style batch (DQN action selection).
    B = 2
    x = jax.random.normal(k_x, (B, N_STATES), dtype=jnp.float32)
    out = jax.block_until_ready(net_forward(x, *params))
    ref = _reference(x, w1, b1, w2, b2)
    assert out.shape == (B, N_ACTIONS)
    assert jnp.allclose(out, ref, atol=1e-4, rtol=1e-4), "mismatch vs reference (B=2)"

    # Larger replay-buffer-style batch to exercise the batch grid / pipelining.
    BL = 512
    xl = jax.random.normal(k_xl, (BL, N_STATES), dtype=jnp.float32)
    out_l = jax.block_until_ready(net_forward(xl, *params))
    ref_l = _reference(xl, w1, b1, w2, b2)
    assert out_l.shape == (BL, N_ACTIONS)
    assert jnp.allclose(out_l, ref_l, atol=1e-4, rtol=1e-4), "mismatch vs reference (B=512)"

    print("KERNEL_OK")
</pallas_src>

<mosaic_0001>
module attributes {stable_mosaic.version = 11 : i64} {
  func.func @_net_kernel(%arg0: i32, %arg1: memref<8x128xf32, #tpu.memory_space<vmem>>, %arg2: memref<128x128xf32, #tpu.memory_space<vmem>>, %arg3: memref<1x128xf32, #tpu.memory_space<vmem>>, %arg4: memref<128x128xf32, #tpu.memory_space<vmem>>, %arg5: memref<1x128xf32, #tpu.memory_space<vmem>>, %arg6: memref<8x128xf32, #tpu.memory_space<vmem>>) attributes {dimension_semantics = [#tpu.dimension_semantics<parallel>], iteration_bounds = array<i64: 1>, scalar_prefetch = 0 : i64, scratch_operands = 0 : i64, tpu.core_type = #tpu.core_type<tc>, window_params = [{transform_indices = @transform_0, window_bounds = array<i64: 8, 128>}, {pipeline_mode = #tpu.pipeline_mode<synchronous>, transform_indices = @transform_1, window_bounds = array<i64: 128, 128>}, {pipeline_mode = #tpu.pipeline_mode<synchronous>, transform_indices = @transform_2, window_bounds = array<i64: 1, 128>}, {pipeline_mode = #tpu.pipeline_mode<synchronous>, transform_indices = @transform_3, window_bounds = array<i64: 128, 128>}, {pipeline_mode = #tpu.pipeline_mode<synchronous>, transform_indices = @transform_4, window_bounds = array<i64: 1, 128>}, {transform_indices = @transform_5, window_bounds = array<i64: 8, 128>}]} {
    %c0 = arith.constant 0 : index
    %c0_0 = arith.constant 0 : index
    %0 = vector.load %arg1[%c0, %c0_0] : memref<8x128xf32, #tpu.memory_space<vmem>>, vector<8x128xf32>
    %c0_1 = arith.constant 0 : index
    %c0_2 = arith.constant 0 : index
    %1 = vector.load %arg2[%c0_1, %c0_2] : memref<128x128xf32, #tpu.memory_space<vmem>>, vector<128x128xf32>
    %cst = arith.constant dense<0.000000e+00> : vector<8x128xf32>
    %2 = tpu.matmul %0, %1, %cst {dimension_numbers = #tpu.dot_dimension_numbers<[1], [0], [0], [1], [0, 0, 1, 1], [], []>} : vector<8x128xf32>, vector<128x128xf32>, vector<8x128xf32> -> vector<8x128xf32>
    %c0_3 = arith.constant 0 : index
    %c0_4 = arith.constant 0 : index
    %3 = vector.load %arg3[%c0_3, %c0_4] : memref<1x128xf32, #tpu.memory_space<vmem>>, vector<1x128xf32>
    %4 = vector.broadcast %3 : vector<1x128xf32> to vector<8x128xf32>
    %5 = arith.addf %2, %4 : vector<8x128xf32>
    %cst_5 = arith.constant 0.000000e+00 : f32
    %6 = vector.broadcast %cst_5 : f32 to vector<8x128xf32>
    %7 = arith.maximumf %5, %6 : vector<8x128xf32>
    %c0_6 = arith.constant 0 : index
    %c0_7 = arith.constant 0 : index
    %8 = vector.load %arg4[%c0_6, %c0_7] : memref<128x128xf32, #tpu.memory_space<vmem>>, vector<128x128xf32>
    %cst_8 = arith.constant dense<0.000000e+00> : vector<8x128xf32>
    %9 = tpu.matmul %7, %8, %cst_8 {dimension_numbers = #tpu.dot_dimension_numbers<[1], [0], [0], [1], [0, 0, 1, 1], [], []>} : vector<8x128xf32>, vector<128x128xf32>, vector<8x128xf32> -> vector<8x128xf32>
    %c0_9 = arith.constant 0 : index
    %c0_10 = arith.constant 0 : index
    %10 = vector.load %arg5[%c0_9, %c0_10] : memref<1x128xf32, #tpu.memory_space<vmem>>, vector<1x128xf32>
    %11 = vector.broadcast %10 : vector<1x128xf32> to vector<8x128xf32>
    %12 = arith.addf %9, %11 : vector<8x128xf32>
    %c0_11 = arith.constant 0 : index
    %c0_12 = arith.constant 0 : index
    %13 = vector.load %arg6[%c0_11, %c0_12] : memref<8x128xf32, #tpu.memory_space<vmem>>, vector<8x128xf32>
    tpu.vector_store %arg6[%c0_11, %c0_12], %12 {strides = array<i32>} : memref<8x128xf32, #tpu.memory_space<vmem>>, vector<8x128xf32>,
    return
  }
  func.func @transform_0(%arg0: i32) -> (i32, i32) {
    %c0_i32 = arith.constant 0 : i32
    %c0_i32_0 = arith.constant 0 : i32
    return %arg0, %c0_i32 : i32, i32
  }
  func.func @transform_1(%arg0: i32) -> (i32, i32) {
    %c0_i32 = arith.constant 0 : i32
    %c0_i32_0 = arith.constant 0 : i32
    %c0_i32_1 = arith.constant 0 : i32
    return %c0_i32, %c0_i32_0 : i32, i32
  }
  func.func @transform_2(%arg0: i32) -> (i32, i32) {
    %c0_i32 = arith.constant 0 : i32
    %c0_i32_0 = arith.constant 0 : i32
    %c0_i32_1 = arith.constant 0 : i32
    return %c0_i32, %c0_i32_0 : i32, i32
  }
  func.func @transform_3(%arg0: i32) -> (i32, i32) {
    %c0_i32 = arith.constant 0 : i32
    %c0_i32_0 = arith.constant 0 : i32
    %c0_i32_1 = arith.constant 0 : i32
    return %c0_i32, %c0_i32_0 : i32, i32
  }
  func.func @transform_4(%arg0: i32) -> (i32, i32) {
    %c0_i32 = arith.constant 0 : i32
    %c0_i32_0 = arith.constant 0 : i32
    %c0_i32_1 = arith.constant 0 : i32
    return %c0_i32, %c0_i32_0 : i32, i32
  }
  func.func @transform_5(%arg0: i32) -> (i32, i32) {
    %c0_i32 = arith.constant 0 : i32
    %c0_i32_0 = arith.constant 0 : i32
    return %arg0, %c0_i32 : i32, i32
  }
}

</mosaic_0001>

<bundles_post_ra>
// kernel: net_forward.1
= control target key start
LH: loop header
LB: loop body
LE: loop exit
PB: predicated region body
PF: predicated region fallthrough
CT: control target
= control target key end

     0   :  { %10 = vsyncpa [#allocation3], 0  ;;  %s541_s0 = inlined_call_operand.vmem [shape: f32[8,128], index: 0, kind: input, shape index: {}]   ;;  %s542_s1 = inlined_call_operand.hbm [shape: f32[128,128], index: 1, kind: input, shape index: {}]   ;;  %s543_s2 = inlined_call_operand.vmem [shape: f32[1,128], index: 2, kind: input, shape index: {}]   ;;  %s544_s3 = inlined_call_operand.hbm [shape: f32[128,128], index: 3, kind: input, shape index: {}]   ;;  %s545_s4 = inlined_call_operand.vmem [shape: f32[1,128], index: 4, kind: input, shape index: {}]   ;;  %s546_s5 = inlined_call_operand.vmem [shape: f32[8,128], index: 5, kind: output, shape index: {}]  }
   0x1   :  { %11 = vsyncpa [#allocation5], 0  ;;  %s452_s18 = smov [#allocation2]   ;;  %s404_s22 = scalar_lea.hbm %s542_s1, 2048 }
   0x2   :  { %s19_s19 = sshll.u32 %s452_s18, 4  ;;  %p405_p0 = scmp.ne.s32.totalorder %s542_s1, %s404_s22  ;;  %s20_s19 = int_to_ptr.vmem [resolvable:$true] %s19_s19 }
   0x3   :  { %p408_p1 = scmp.lt.u32.totalorder %s404_s22, %s542_s1 }
   0x5   :  { %p410_p2 = pnand %p408_p1, %p405_p0 }
   0x7   :  { %413 = shalt.err (!%p410_p2)
}
   0x8   :  { %s414_s27 = scalar_lea.vmem %s20_s19, 2048  ;;  %p419_p4 = scmp.lt.s32.totalorder %s20_s19, %s20_s19 }
   0x9   :  { %p415_p3 = scmp.ne.s32.totalorder %s20_s19, %s414_s27  ;;  %p420_p5 = scmp.lt.s32.totalorder %s414_s27, %s414_s27 }
   0xb   :  { %p421_p6 = por %p420_p5, %p419_p4 }
   0xd   :  { %p422_p7 = pnand %p421_p6, %p415_p3 }
   0xf   :  { %425 = shalt.err (!%p422_p7)
}
  0x10   :  { %s453_s28 = smov 128   ;;  %s454_s29 = smov 8  }
  0x11   :  { %25 = dma.hbm_to_vmem [thread:$0]  %s542_s1, 2048, %s20_s19, [#allocation3], %s453_s28, %s453_s28, %s454_s29  }
  0x12   :  { %s455_s7 = smov [#allocation4]   ;;  %s426_s11 = scalar_lea.hbm %s544_s3, 2048 }
  0x13   :  { %s33_s8 = sshll.u32 %s455_s7, 4  ;;  %p427_p8 = scmp.ne.s32.totalorder %s544_s3, %s426_s11  ;;  %s34_s8 = int_to_ptr.vmem [resolvable:$true] %s33_s8 }
  0x14   :  { %p430_p9 = scmp.lt.u32.totalorder %s426_s11, %s544_s3 }
  0x16   :  { %p432_p10 = pnand %p430_p9, %p427_p8 }
  0x18   :  { %435 = shalt.err (!%p432_p10)
}
  0x19   :  { %s436_s16 = scalar_lea.vmem %s34_s8, 2048  ;;  %p441_p12 = scmp.lt.s32.totalorder %s34_s8, %s34_s8 }
  0x1a   :  { %p437_p11 = scmp.ne.s32.totalorder %s34_s8, %s436_s16  ;;  %p442_p13 = scmp.lt.s32.totalorder %s436_s16, %s436_s16 }
  0x1c   :  { %p443_p0 = por %p442_p13, %p441_p12 }
  0x1e   :  { %p444_p1 = pnand %p443_p0, %p437_p11 }
  0x20   :  { %447 = shalt.err (!%p444_p1)
}
  0x21   :  { %39 = dma.hbm_to_vmem [thread:$0]  %s544_s3, 2048, %s34_s8, [#allocation5], %s453_s28, %s453_s28, %s454_s29  }
  0x22   :  { %448 = dma.done.wait [#allocation3], 2048  }
  0x23   :  { %449 = vsyncadd [#allocation3], 4294965248 }
  0x24   :  { %450 = dma.done.wait [#allocation5], 2048  }
  0x25   :  { %451 = vsyncadd [#allocation5], 4294965248  ;;  %v456_v0 = vmov 0.0|0.0   ;;  %vm457_vm0 = vmmov 0   ;;  %v458_v1 = vmov 0.0   ;;  %v49_v2 = vld [vmem:[#allocation2] sm:$0xff] }
  0x26   :  { %349 = vmatprep.subr.bf16.mxu0 %v456_v0  ;;  %311 = vmatprep.mubr.msk.f32.mxu0 %vm457_vm0, %v458_v1  ;;  %v50_v3 = vld [vmem:[#allocation2 + $0x8] sm:$0xff]  ;;  %v51_v4 = vld [vmem:[#allocation2 + $0x10] sm:$0xff]  ;;  %v52_v6 = vld [vmem:[#allocation2 + $0x18] sm:$0xff] }
  0x27   :  { %373 = vmatprep.subr.bf16.mxu1 %v456_v0  ;;  %346 = vmatprep.mubr.msk.f32.mxu1 %vm457_vm0, %v458_v1  ;;  %v350_v5 = vpack.c.bf16 %v50_v3, %v49_v2  ;;  %v353_v7 = vpack.c.bf16 %v52_v6, %v51_v4  ;;  %v53_v8 = vld [vmem:[#allocation2 + $0x20] sm:$0xff]  ;;  %v54_v9 = vld [vmem:[#allocation2 + $0x28] sm:$0xff]  ;;  %v145_v12 = vld [vmem:[#allocation4 + $0x10] sm:$0xff] }
  0x28   :  { %v143_v10 = vld [vmem:[#allocation4] sm:$0xff]  ;;  %v144_v11 = vld [vmem:[#allocation4 + $0x8] sm:$0xff]  ;;  %v146_v13 = vld [vmem:[#allocation4 + $0x18] sm:$0xff]  ;;  %v356_v14 = vpack.c.bf16 %v54_v9, %v53_v8 }
  0x29   :  { %351 = vmatpush3.bf16.msra.mxu0 %v350_v5  ;;  %v374_v15 = vpack.c.bf16 %v144_v11, %v143_v10  ;;  %v55_v16 = vld [vmem:[#allocation2 + $0x30] sm:$0xff]  ;;  %v56_v17 = vld [vmem:[#allocation2 + $0x38] sm:$0xff]  ;;  %v377_v18 = vpack.c.bf16 %v146_v13, %v145_v12  ;;  %v147_v19 = vld [vmem:[#allocation4 + $0x20] sm:$0xff] }
  0x2a   :  { %352 = vmatprep.subr.bf16.mxu0 %v456_v0  ;;  %v148_v20 = vld [vmem:[#allocation4 + $0x28] sm:$0xff]  ;;  %v359_v21 = vpack.c.bf16 %v56_v17, %v55_v16  ;;  %v57_v22 = vld [vmem:[#allocation2 + $0x40] sm:$0xff]  ;;  %v149_v25 = vld [vmem:[#allocation4 + $0x30] sm:$0xff] }
  0x2b   :  { %375 = vmatpush3.bf16.msra.mxu1 %v374_v15  ;;  %v58_v23 = vld [vmem:[#allocation2 + $0x48] sm:$0xff]  ;;  %v380_v24 = vpack.c.bf16 %v148_v20, %v147_v19  ;;  %v150_v26 = vld [vmem:[#allocation4 + $0x38] sm:$0xff]  ;;  %v59_v28 = vld [vmem:[#allocation2 + $0x50] sm:$0xff] }
  0x2c   :  { %376 = vmatprep.subr.bf16.mxu1 %v456_v0  ;;  %v362_v27 = vpack.c.bf16 %v58_v23, %v57_v22  ;;  %v60_v29 = vld [vmem:[#allocation2 + $0x58] sm:$0xff]  ;;  %v383_v30 = vpack.c.bf16 %v150_v26, %v149_v25  ;;  %v151_v31 = vld [vmem:[#allocation4 + $0x40] sm:$0xff]  ;;  %v152_v32 = vld [vmem:[#allocation4 + $0x48] sm:$0xff] }
  0x2d   :  { %354 = vmatpush3.bf16.msra.mxu0 %v353_v7  ;;  %v365_v33 = vpack.c.bf16 %v60_v29, %v59_v28  ;;  %v61_v34 = vld [vmem:[#allocation2 + $0x60] sm:$0xff]  ;;  %v62_v35 = vld [vmem:[#allocation2 + $0x68] sm:$0xff]  ;;  %v386_v36 = vpack.c.bf16 %v152_v32, %v151_v31  ;;  %v153_v37 = vld [vmem:[#allocation4 + $0x50] sm:$0xff] }
  0x2e   :  { %355 = vmatprep.subr.bf16.mxu0 %v456_v0  ;;  %v154_v38 = vld [vmem:[#allocation4 + $0x58] sm:$0xff]  ;;  %v368_v39 = vpack.c.bf16 %v62_v35, %v61_v34  ;;  %v63_v40 = vld [vmem:[#allocation2 + $0x70] sm:$0xff]  ;;  %v155_v43 = vld [vmem:[#allocation4 + $0x60] sm:$0xff] }
  0x2f   :  { %378 = vmatpush3.bf16.msra.mxu1 %v377_v18  ;;  %v64_v41 = vld [vmem:[#allocation2 + $0x78] sm:$0xff]  ;;  %v389_v42 = vpack.c.bf16 %v154_v38, %v153_v37  ;;  %v156_v44 = vld [vmem:[#allocation4 + $0x68] sm:$0xff]  ;;  %v48_v47 = vld [vmem:[%s541_s0] sm:$0xff] }
  0x30   :  { %379 = vmatprep.subr.bf16.mxu1 %v456_v0  ;;  %v371_v45 = vpack.c.bf16 %v64_v41, %v63_v40  ;;  %v392_v46 = vpack.c.bf16 %v156_v44, %v155_v43  ;;  %v157_v48 = vld [vmem:[#allocation4 + $0x70] sm:$0xff]  ;;  %v158_v49 = vld [vmem:[#allocation4 + $0x78] sm:$0xff]  ;;  %v243_v51 = vld [vmem:[%s543_s2] ss:$0 sm:$0xff] }
  0x31   :  { %357 = vmatpush3.bf16.msra.mxu0 %v356_v14  ;;  %v395_v50 = vpack.c.bf16 %v158_v49, %v157_v48  ;;  %v244_v56 = vld [vmem:[%s545_s4] ss:$0 sm:$0xff] }
  0x32   :  { %358 = vmatprep.subr.bf16.mxu0 %v456_v0 }
  0x33   :  { %381 = vmatpush3.bf16.msra.mxu1 %v380_v24 }
  0x34   :  { %382 = vmatprep.subr.bf16.mxu1 %v456_v0 }
  0x35   :  { %360 = vmatpush3.bf16.msra.mxu0 %v359_v21 }
  0x36   :  { %361 = vmatprep.subr.bf16.mxu0 %v456_v0 }
  0x37   :  { %384 = vmatpush3.bf16.msra.mxu1 %v383_v30 }
  0x38   :  { %385 = vmatprep.subr.bf16.mxu1 %v456_v0 }
  0x39   :  { %363 = vmatpush3.bf16.msra.mxu0 %v362_v27 }
  0x3a   :  { %364 = vmatprep.subr.bf16.mxu0 %v456_v0 }
  0x3b   :  { %387 = vmatpush3.bf16.msra.mxu1 %v386_v36 }
  0x3c   :  { %388 = vmatprep.subr.bf16.mxu1 %v456_v0 }
  0x3d   :  { %366 = vmatpush3.bf16.msra.mxu0 %v365_v33 }
  0x3e   :  { %367 = vmatprep.subr.bf16.mxu0 %v456_v0 }
  0x3f   :  { %390 = vmatpush3.bf16.msra.mxu1 %v389_v42 }
  0x40   :  { %391 = vmatprep.subr.bf16.mxu1 %v456_v0 }
  0x41   :  { %369 = vmatpush3.bf16.msra.mxu0 %v368_v39 }
  0x42   :  { %370 = vmatprep.subr.bf16.mxu0 %v456_v0 }
  0x43   :  { %393 = vmatpush3.bf16.msra.mxu1 %v392_v46 }
  0x44   :  { %394 = vmatprep.subr.bf16.mxu1 %v456_v0 }
  0x45   :  { %372 = vmatpush3.bf16.msra.mxu0 %v371_v45 }
  0x47   :  { %396 = vmatpush3.bf16.msra.mxu1 %v395_v50 }
  0x48   :  { %312 = vmatmul.mubr.f32.vlgmr.msra.gmra.mrb[0].mxu0 %v48_v47 }
 0x11b   :  { %v138_v52 = vpop.f32.mrb[0].mxu0 }
 0x11c   :  { %v139_v53 = vadd.f32 %v243_v51, %v138_v52  ;;  %v313_v54 = vpop.f32.mrb[1].mxu0 }
 0x11e   :  { %v142_v55 = vmax.f32 %v139_v53, 0.0 }
 0x120   :  { %347 = vmatmul.mubr.f32.vlgmr.msra.gmra.mrb[0].mxu1 %v142_v55 }
 0x1f3   :  { %v232_v57 = vpop.f32.mrb[0].mxu1 }
 0x1f4   :  { %v233_v58 = vadd.f32 %v244_v56, %v232_v57  ;;  %v348_v59 = vpop.f32.mrb[1].mxu1 }
 0x1f6   :  { %236 = vst [vmem:[%s546_s5] sm:$0xff] %v233_v58 }
 0x1f7   :  { %241 = vsyncpa [#allocation3], 1 }
 0x1f8   :  { %242 = vsyncpa [#allocation5], 1 }

</bundles_post_ra>
